<compile_context>
chip_gen: v5e
topology: v5e:2x2
jax: 0.10.0
libtpu: 0.0.40
codegen_flags: <defaults>
</compile_context>

<pallas_src>
import functools

import jax
import jax.numpy as jnp
from jax import lax
from jax.experimental import pallas as pl
from jax.experimental.pallas import tpu as pltpu

_LANE = 128      # lane width (last-dim vreg extent)
_CHUNK = 512     # target in-kernel chunk width (columns along the lane axis)


def _round_down(v, m):
    return (v // m) * m


def _choose_tiling(n, hw, target_cols):
    """Pick (bn, tile_hw): batch rows and spatial columns per grid step.

    Constraints:
      * tile_hw == hw (full dim) or tile_hw % 128 == 0        (lane rule)
      * bn <= n
      * bn * tile_hw ~= target_cols (amortizes ~0.35us per grid step)
      * >= 2 grid steps whenever the input is big enough (v7x megacore)
    """
    if hw >= target_cols:
        tile_hw = max(_CHUNK, _round_down(target_cols, _CHUNK))
        bn = 1
    else:
        if hw % _LANE == 0 or hw <= 1024:
            tile_hw = hw                          # full-dim block (always legal)
        else:
            tile_hw = _round_down(hw, _LANE)      # lane-aligned main block + tiny ragged tail
        bn = max(1, min(n, target_cols // max(tile_hw, 1)))

    steps = pl.cdiv(n, bn) * pl.cdiv(hw, tile_hw)
    if steps < 2:                                 # give v7x's second TensorCore some work
        if n >= 2:
            bn = pl.cdiv(n, 2)
        elif hw >= 2 * _LANE:
            tile_hw = max(_LANE, _round_down(pl.cdiv(hw, 2), _LANE))
    return bn, tile_hw


def _choose_chunk(bn, tile_hw):
    """In-kernel chunk (bc rows, ch columns): bc*ch ~= _CHUNK cols, register resident."""
    if tile_hw % _LANE == 0 and tile_hw >= _CHUNK:
        ch = _CHUNK
        bc = 1
    else:
        ch = tile_hw
        bc = max(1, min(bn, _CHUNK // max(ch, 1)))
    return bc, ch


def _make_kernel(bn, cin, tile_hw, two_s, bc, ch):
    nb = pl.cdiv(bn, bc)
    nc = pl.cdiv(tile_hw, ch)
    total = nb * nc
    b_last = bn - bc                   # clamp targets for the (idempotent) ragged chunks
    c_last = tile_hw - ch
    aligned = (ch % _LANE == 0) and (c_last % _LANE == 0)

    def kernel(x_ref, wb_ref, bias_ref, o_ref):
        # x_ref   : (bn, cin, tile_hw)    VMEM f32 -- pixels, spatial-last (lane dense)
        # wb_ref  : (two_s, bc, cin, ch)  VMEM f32 -- folded weight, pre-broadcast to chunk shape
        # bias_ref: (1,)                  SMEM f32 -- folded scalar bias
        # o_ref   : (bn, two_s, tile_hw)  VMEM f32
        wb = wb_ref[...]               # <= 64 KiB; hoisted out of the chunk loop
        bias = bias_ref[0]

        def do_chunk(ib, jc):
            if isinstance(ib, int):                       # fully static path (tiny tiles)
                b0 = min(ib * bc, b_last)
                start = min(jc * ch, c_last)
            else:
                b0 = jnp.minimum(ib * bc, b_last)
                start = jnp.minimum(jc * ch, c_last)
                if aligned:
                    start = pl.multiple_of(start, _LANE)
            xc = x_ref[pl.ds(b0, bc), :, pl.ds(start, ch)]        # (bc, cin, ch), in regs
            for o in range(two_s):                                 # two_s == 2, unrolled
                # VPU multiplies + sublane-axis reduce (XLU); the MXU is never touched.
                y = jnp.sum(xc * wb[o], axis=1) + bias             # (bc, ch), f32 accumulate
                o_ref[pl.ds(b0, bc), o, pl.ds(start, ch)] = y.astype(o_ref.dtype)

        if total <= 8:
            for it in range(total):                                # static indices
                do_chunk(it // nc, it % nc)
        else:
            def body(it, carry):
                do_chunk(it // nc, it % nc)
                return carry
            lax.fori_loop(0, total, body, 0, unroll=2)

    return kernel


@functools.partial(jax.jit, static_argnames=("target_block_cols",))
def bayesian_hints_resnet_forward(x_nchw, w_net, b_net, w_skip, *, target_block_cols=131072):
    """x_nchw: (N, hints_len, H, W) float32
       w_net : (sid_bins, hints_len)      (1x1 conv weight, k-dims squeezed)
       b_net : (sid_bins,)
       w_skip: (2*sid_bins, hints_len)
       returns (N, 2*sid_bins, H, W) float32
    """
    n, cin, h, w = x_nchw.shape
    s = w_net.shape[0]
    two_s = w_skip.shape[0]
    if s != 1 or two_s != 2 * s:
        raise ValueError(
            "BayesianHintsResNet.forward only broadcasts (and the fused kernel "
            "only folds) when sid_bins == 1; got sid_bins=%d" % s)

    hw = h * w
    target_cols = max(1024, min(int(target_block_cols), 262144))
    bn, tile_hw = _choose_tiling(n, hw, target_cols)
    bc, ch = _choose_chunk(bn, tile_hw)

    # Free reshapes only -- no transposes, no padding, no post-slice.
    x3 = x_nchw.reshape(n, cin, hw)                                    # (N, Cin, HW)
    w_comb = (w_skip + w_net[0:1, :]).astype(jnp.float32)              # (2S, Cin)
    wb = jnp.broadcast_to(w_comb[:, None, :, None], (two_s, bc, cin, ch))
    b_comb = b_net.reshape(1).astype(jnp.float32)                      # scalar bias, via SMEM

    grid = (pl.cdiv(n, bn), pl.cdiv(hw, tile_hw))

    # Explicit VMEM budget: double-buffered blocks + headroom, capped for v7x (64 MiB physical).
    bytes_in = bn * cin * tile_hw * 4
    bytes_out = bn * two_s * tile_hw * 4
    bytes_wb = two_s * bc * cin * ch * 4
    vmem_limit = 2 * (bytes_in + bytes_out + bytes_wb) + (4 << 20)
    vmem_limit = int(min(max(vmem_limit, 32 << 20), 56 << 20))

    kernel = _make_kernel(bn, cin, tile_hw, two_s, bc, ch)

    out3 = pl.pallas_call(
        kernel,
        out_shape=jax.ShapeDtypeStruct((n, two_s, hw), jnp.float32),
        grid=grid,
        in_specs=[
            pl.BlockSpec((bn, cin, tile_hw), lambda i, j: (i, 0, j)),       # pixel tile
            pl.BlockSpec((two_s, bc, cin, ch), lambda i, j: (0, 0, 0, 0)),  # folded weight (resident)
            pl.BlockSpec(memory_space=pltpu.MemorySpace.SMEM),              # scalar bias
        ],
        out_specs=pl.BlockSpec((bn, two_s, tile_hw), lambda i, j: (i, 0, j)),
        compiler_params=pltpu.CompilerParams(
            dimension_semantics=("parallel", "parallel"),
            vmem_limit_bytes=vmem_limit),
        cost_estimate=pl.CostEstimate(
            flops=2 * two_s * cin * n * hw,
            transcendentals=0,
            bytes_accessed=(cin + two_s) * 4 * n * hw),
    )(x3, wb, b_comb)

    return out3.reshape(n, two_s, h, w)


def make_params(hints_len, sid_bins, key):
    """Deterministic parameter construction mirroring the module's __init__."""
    # --- skip branch: BayesianHints conv weight (2*sid_bins, hints_len), no bias ---
    i_idx = jnp.arange(sid_bins)[:, None]              # output-bin index
    j_idx = jnp.arange(hints_len)[None, :]             # hint index
    a = ((j_idx >= i_idx) & (i_idx < hints_len)).astype(jnp.float32)   # (S, Cin)
    b = 1.0 - a
    w_skip = jnp.zeros((2 * sid_bins, hints_len), jnp.float32)
    w_skip = w_skip.at[1::2, :].set(a)                 # odd channels  <- A
    w_skip = w_skip.at[0::2, :].set(b)                 # even channels <- B

    # --- net branch: Conv2d(hints_len, sid_bins, k=1) with bias (random but deterministic) ---
    kw, kb = jax.random.split(key)
    bound = 1.0 / jnp.sqrt(jnp.float32(hints_len))
    w_net = jax.random.uniform(kw, (sid_bins, hints_len), jnp.float32, -bound, bound)
    b_net = jax.random.uniform(kb, (sid_bins,), jnp.float32, -bound, bound)
    return w_net, b_net, w_skip


def _reference(x_nchw, w_net, b_net, w_skip):
    # Pure-JAX reference of the same math (1x1 convs as einsums).
    x1 = jnp.einsum("nchw,oc->nohw", x_nchw, w_net) + b_net[None, :, None, None]
    x2 = jnp.einsum("nchw,oc->nohw", x_nchw, w_skip)
    return x1 + x2  # broadcast over channel (sid_bins == 1)


def _check(x, w_net, b_net, w_skip):
    out = bayesian_hints_resnet_forward(x, w_net, b_net, w_skip)
    out = jax.block_until_ready(out)
    ref = _reference(x, w_net, b_net, w_skip)
    assert out.shape == ref.shape, (out.shape, ref.shape)
    assert jnp.allclose(out, ref, atol=1e-5, rtol=1e-5), "mismatch vs reference"
    return out


if __name__ == "__main__":
    hints_len = 8
    sid_bins = 1          # the reference forward only broadcasts when sid_bins == 1

    key = jax.random.PRNGKey(0)
    k_x1, k_x2, k_x3, k_p = jax.random.split(key, 4)
    w_net, b_net, w_skip = make_params(hints_len, sid_bins, k_p)

    # 1) module-scale demo: small HW, batch-parallel grid, fully static kernel path.
    x = jax.random.normal(k_x1, (2, hints_len, 16, 16), jnp.float32)
    out = _check(x, w_net, b_net, w_skip)
    assert out.shape == (2, 2 * sid_bins, 16, 16), out.shape

    # 2) exercises megacore batch split, ragged batch tail and the rolled chunk loop.
    x2 = jax.random.normal(k_x2, (3, hints_len, 64, 64), jnp.float32)
    _check(x2, w_net, b_net, w_skip)

    # 3) exercises a non-128-aligned HW (lane-rounded main block + ragged spatial tail).
    x3 = jax.random.normal(k_x3, (2, hints_len, 40, 40), jnp.float32)
    _check(x3, w_net, b_net, w_skip)

    print("KERNEL_OK")
</pallas_src>

<mosaic_0001>
module attributes {stable_mosaic.version = 11 : i64} {
  func.func @kernel(%arg0: i32, %arg1: i32, %arg2: memref<1x8x256xf32, #tpu.memory_space<vmem>>, %arg3: memref<2x1x8x256xf32, #tpu.memory_space<vmem>>, %arg4: memref<1xf32, #tpu.memory_space<smem>>, %arg5: memref<1x2x256xf32, #tpu.memory_space<vmem>>) attributes {dimension_semantics = [#tpu.dimension_semantics<parallel>, #tpu.dimension_semantics<parallel>], iteration_bounds = array<i64: 2, 1>, scalar_prefetch = 0 : i64, scratch_operands = 0 : i64, tpu.core_type = #tpu.core_type<tc>, window_params = [{transform_indices = @transform_0, window_bounds = array<i64: 1, 8, 256>}, {pipeline_mode = #tpu.pipeline_mode<synchronous>, transform_indices = @transform_1, window_bounds = array<i64: 2, 1, 8, 256>}, {transform_indices = @transform_2, window_bounds = array<i64: 1>}, {transform_indices = @transform_3, window_bounds = array<i64: 1, 2, 256>}]} {
    %c0 = arith.constant 0 : index
    %c0_0 = arith.constant 0 : index
    %c0_1 = arith.constant 0 : index
    %c0_2 = arith.constant 0 : index
    %0 = vector.load %arg3[%c0, %c0_0, %c0_1, %c0_2] : memref<2x1x8x256xf32, #tpu.memory_space<vmem>>, vector<2x1x8x256xf32>
    %c0_3 = arith.constant 0 : index
    %1 = memref.load %arg4[%c0_3] : memref<1xf32, #tpu.memory_space<smem>>
    %c0_4 = arith.constant 0 : index
    %c0_5 = arith.constant 0 : index
    %c0_6 = arith.constant 0 : index
    %2 = vector.load %arg2[%c0_4, %c0_5, %c0_6] : memref<1x8x256xf32, #tpu.memory_space<vmem>>, vector<1x8x256xf32>
    %3 = vector.extract_strided_slice %0 {offsets = [0, 0, 0, 0], sizes = [1, 1, 8, 256], strides = [1, 1, 1, 1]} : vector<2x1x8x256xf32> to vector<1x1x8x256xf32>
    %4 = vector.shape_cast %3 : vector<1x1x8x256xf32> to vector<1x8x256xf32>
    %5 = arith.mulf %2, %4 : vector<1x8x256xf32>
    %cst = arith.constant dense<0.000000e+00> : vector<1x256xf32>
    %6 = vector.multi_reduction <add>, %5, %cst [1] : vector<1x8x256xf32> to vector<1x256xf32>
    %7 = vector.broadcast %1 : f32 to vector<1x256xf32>
    %8 = arith.addf %6, %7 : vector<1x256xf32>
    %c0_7 = arith.constant 0 : index
    %c0_8 = arith.constant 0 : index
    %c0_9 = arith.constant 0 : index
    %9 = vector.load %arg5[%c0_7, %c0_8, %c0_9] : memref<1x2x256xf32, #tpu.memory_space<vmem>>, vector<1x1x256xf32>
    %10 = vector.shape_cast %9 : vector<1x1x256xf32> to vector<1x256xf32>
    %11 = vector.shape_cast %8 : vector<1x256xf32> to vector<1x1x256xf32>
    tpu.vector_store %arg5[%c0_7, %c0_8, %c0_9], %11 {strides = array<i32>} : memref<1x2x256xf32, #tpu.memory_space<vmem>>, vector<1x1x256xf32>,
    %12 = vector.extract_strided_slice %0 {offsets = [1, 0, 0, 0], sizes = [1, 1, 8, 256], strides = [1, 1, 1, 1]} : vector<2x1x8x256xf32> to vector<1x1x8x256xf32>
    %13 = vector.shape_cast %12 : vector<1x1x8x256xf32> to vector<1x8x256xf32>
    %14 = arith.mulf %2, %13 : vector<1x8x256xf32>
    %cst_10 = arith.constant dense<0.000000e+00> : vector<1x256xf32>
    %15 = vector.multi_reduction <add>, %14, %cst_10 [1] : vector<1x8x256xf32> to vector<1x256xf32>
    %16 = vector.broadcast %1 : f32 to vector<1x256xf32>
    %17 = arith.addf %15, %16 : vector<1x256xf32>
    %c0_11 = arith.constant 0 : index
    %c1 = arith.constant 1 : index
    %c0_12 = arith.constant 0 : index
    %18 = vector.load %arg5[%c0_11, %c1, %c0_12] : memref<1x2x256xf32, #tpu.memory_space<vmem>>, vector<1x1x256xf32>
    %19 = vector.shape_cast %18 : vector<1x1x256xf32> to vector<1x256xf32>
    %20 = vector.shape_cast %17 : vector<1x256xf32> to vector<1x1x256xf32>
    tpu.vector_store %arg5[%c0_11, %c1, %c0_12], %20 {strides = array<i32>} : memref<1x2x256xf32, #tpu.memory_space<vmem>>, vector<1x1x256xf32>,
    return
  }
  func.func @transform_0(%arg0: i32, %arg1: i32) -> (i32, i32, i32) {
    %c0_i32 = arith.constant 0 : i32
    %c0_i32_0 = arith.constant 0 : i32
    return %arg0, %c0_i32, %arg1 : i32, i32, i32
  }
  func.func @transform_1(%arg0: i32, %arg1: i32) -> (i32, i32, i32, i32) {
    %c0_i32 = arith.constant 0 : i32
    %c0_i32_0 = arith.constant 0 : i32
    %c0_i32_1 = arith.constant 0 : i32
    %c0_i32_2 = arith.constant 0 : i32
    %c0_i32_3 = arith.constant 0 : i32
    return %c0_i32, %c0_i32_0, %c0_i32_1, %c0_i32_2 : i32, i32, i32, i32
  }
  func.func @transform_2(%arg0: i32, %arg1: i32) -> i32 {
    %c0_i32 = arith.constant 0 : i32
    %c0_i32_0 = arith.constant 0 : i32
    return %c0_i32 : i32
  }
  func.func @transform_3(%arg0: i32, %arg1: i32) -> (i32, i32, i32) {
    %c0_i32 = arith.constant 0 : i32
    %c0_i32_0 = arith.constant 0 : i32
    return %arg0, %c0_i32, %arg1 : i32, i32, i32
  }
}

</mosaic_0001>

<bundles_post_ra>
// kernel: bayesian_hints_resnet_forward.1
= control target key start
LH: loop header
LB: loop body
LE: loop exit
PB: predicated region body
PF: predicated region fallthrough
CT: control target
= control target key end

     0   :  { %s441_s14 = smov 0   ;;  %s443_s15 = smov 0   ;;  %s490_s0 = inlined_call_operand.vmem [shape: f32[2,8,256], index: 0, kind: input, shape index: {}]   ;;  %s491_s1 = inlined_call_operand.vmem [shape: f32[2,1,8,256], index: 1, kind: input, shape index: {}]   ;;  %s492_s2 = inlined_call_operand.<no memory space> [shape: f32[1], index: 2, kind: input, shape index: {}]   ;;  %s493_s3 = inlined_call_operand.vmem [shape: f32[2,2,256], index: 3, kind: output, shape index: {}]  }
   0x1   :  { %8 = sst [smem:[#allocation2]] %s492_s2  ;;  %s445_s16 = smov 0  }
   0x2 LB: > { %s26_s2 = sadd.s32 1, %s412_s15  ;;  %p360_p0 = scmp.ge.s32.totalorder %s416_s16, 1  ;;  %s416_s16 = sphi %s445_s16, %s14_s16   ;;  %s412_s15 = sphi %s443_s15, %s495_s15   ;;  %s408_s14 = sphi %s441_s14, %s494_s14  }
   0x3   : > { %p28_p1 = scmp.ge.s32.totalorder %s26_s2, 2  ;;  %p159_p2 = scmp.lt.s32.totalorder %s416_s16, 3 }
   0x5   : > { %s497_s2 = smov (%p28_p1, %s26_s2), 0  ;;  %p160_p3 = pnand %p360_p0, %p159_p2 }
   0x6   : > { %p192_p4 = scmp.lt.s32.totalorder (!%p160_p3), %s408_s14, 1  ;;  %s215_s29 = sld [smem:[#allocation2]] (!%p160_p3) }
   0x7   : > { %163 = sbr.rel (%p160_p3) target bundleno = 37 (0x25), region = 32 }
   0xc   : > { %s499_s14 = smov (!%p192_p4, %s408_s14), 1  ;;  %v211_v0 = vld [vmem:[%s491_s1] sm:$0xff]  ;;  %v212_v1 = vld [vmem:[%s491_s1 + $0x8] sm:$0xff]  ;;  %v213_v2 = vld [vmem:[%s491_s1 + $0x10] sm:$0xff]  ;;  %v232_v30 = vstv %s215_s29  ;;  %v241_v31 = vlaneseq  ;;  %vm238_vm0 = vcmask 1040384  }
   0xd   : > { %s368_s19 = sshll.u32 %s499_s14, 4  ;;  %v214_v3 = vld [vmem:[%s491_s1 + $0x18] sm:$0xff]  ;;  %s369_s30 = sshll.u32 %s499_s14, 2 }
   0xe   : > { %s199_s28 = scalar_lea.vmem %s490_s0, %s368_s19  ;;  %s209_s6 = scalar_lea.vmem %s493_s3, %s369_s30  ;;  %vm243_vm1 = vcmp.lt.s32.totalorder %v241_v31, 256 }
   0xf   : > { %v216_v4 = vld [vmem:[%s199_s28] sm:$0xff]  ;;  %v217_v5 = vld [vmem:[%s199_s28 + $0x8] sm:$0xff] }
  0x10   : > { %v218_v6 = vmul.f32 %v216_v4, %v211_v0  ;;  %v219_v7 = vmul.f32 %v217_v5, %v212_v1  ;;  %v246_v8 = vmul.f32 %v216_v4, %v213_v2  ;;  %v247_v9 = vmul.f32 %v217_v5, %v214_v3 }
  0x12   : > { %v220_v10 = vrot.slane %v218_v6, 4  ;;  %v226_v11 = vrot.slane %v219_v7, 4  ;;  %v248_v12 = vrot.slane %v246_v8, 4  ;;  %v254_v13 = vrot.slane %v247_v9, 4 }
  0x14   : > { %v221_v14 = vadd.f32 %v220_v10, %v218_v6  ;;  %v227_v15 = vadd.f32 %v226_v11, %v219_v7  ;;  %v249_v16 = vadd.f32 %v248_v12, %v246_v8  ;;  %v255_v17 = vadd.f32 %v254_v13, %v247_v9 }
  0x16   : > { %v222_v18 = vrot.slane %v221_v14, 2  ;;  %v228_v19 = vrot.slane %v227_v15, 2  ;;  %v256_v20 = vrot.slane %v255_v17, 2  ;;  %v250_v21 = vrot.slane %v249_v16, 2 }
  0x18   : > { %v223_v22 = vadd.f32 %v222_v18, %v221_v14  ;;  %v229_v23 = vadd.f32 %v228_v19, %v227_v15  ;;  %v251_v24 = vadd.f32 %v250_v21, %v249_v16  ;;  %v257_v25 = vadd.f32 %v256_v20, %v255_v17 }
  0x1a   : > { %v224_v26 = vrot.slane %v223_v22, 1  ;;  %v230_v27 = vrot.slane %v229_v23, 1  ;;  %v252_v28 = vrot.slane %v251_v24, 1  ;;  %v258_v29 = vrot.slane %v257_v25, 1 }
  0x1c   : > { %v225_v32 = vadd.f32 %v224_v26, %v223_v22  ;;  %v231_v33 = vadd.f32 %v230_v27, %v229_v23  ;;  %v253_v34 = vadd.f32 %v252_v28, %v251_v24  ;;  %v259_v35 = vadd.f32 %v258_v29, %v257_v25 }
  0x1e   : > { %v233_v36 = vadd.f32 %v232_v30, %v225_v32  ;;  %v234_v37 = vadd.f32 %v232_v30, %v231_v33  ;;  %v260_v38 = vadd.f32 %v253_v34, %v232_v30  ;;  %v261_v39 = vadd.f32 %v259_v35, %v232_v30 }
  0x20   : > { %v237_v40 = vrot.slane %v234_v37, 7  ;;  %v264_v41 = vrot.slane %v261_v39, 7 }
  0x22   : > { %v239_v42 = vsel %vm238_vm0, %v233_v36, %v237_v40  ;;  %v265_v43 = vsel %vm238_vm0, %v260_v38, %v264_v41 }
  0x23   : > { %245 = vst.msk [vmem:[%s209_s6] ss:$2 sm:$0x3] %vm243_vm1, %v239_v42 }
  0x24   : > { %365 = vst.msk [vmem:[%s209_s6 + $0x1] ss:$2 sm:$0x3] %vm243_vm1, %v265_v43 }
  0x25 PF: > { %s14_s16 = sadd.s32 1, %s416_s16   ;;  %s494_s14 = smov %s412_s15 }
  0x26   : > { %p11_p5 = scmp.ge.s32.totalorder %s14_s16, 4   ;;  %s495_s15 = smov %s497_s2 }
  0x28   :  { %13 = sbr.rel (!%p11_p5) target bundleno = 2 (0x2), region = 63 }

</bundles_post_ra>
